<compile_context>
chip_gen: v5e
topology: v5e:2x2
jax: 0.10.0
libtpu: 0.0.40
codegen_flags: <defaults>
</compile_context>

<pallas_src>
import functools

import jax
import jax.numpy as jnp
from jax import lax
from jax.experimental import pallas as pl
from jax.experimental.pallas import tpu as pltpu

EPS = 1e-5
INV_SQRT2 = 0.7071067811865476


def projection_head_kernel(x_ref, w1_ref, w2_ref, params_ref, o_ref, *,
                           gelu_approx):
    # x tile arrives in its original dtype; cast in-kernel to the matmul dtype
    # so no separate XLA cast pass (and no extra HBM traffic) is needed.
    x = x_ref[...].astype(w1_ref.dtype)

    params = params_ref[...]          # (4, P) f32, lane-dense
    b1 = params[0:1, :]
    b2 = params[1:2, :]
    gamma = params[2:3, :]
    beta = params[3:4, :]

    # projection: x @ W1 + b1   (MXU, f32 accumulation)
    projected = jnp.dot(x, w1_ref[...], preferred_element_type=jnp.float32) + b1

    # GELU. tanh-approx routes through the EUP slot (otherwise idle) instead of
    # a long erf polynomial on the VALU; exact erf kept behind a flag for strict
    # parity with PyTorch nn.GELU() default.
    if gelu_approx:
        h = jax.nn.gelu(projected, approximate=True)
    else:
        h = 0.5 * projected * (1.0 + lax.erf(projected * INV_SQRT2))

    # fc: h @ W2, then bias + residual fused into a single elementwise pass.
    y = jnp.dot(h.astype(w2_ref.dtype), w2_ref[...],
                preferred_element_type=jnp.float32) + (projected + b2)

    # TODO(synk): dropout is identity (eval-mode semantics); training-mode
    # stochastic dropout would use pltpu.prng_seed / pltpu.prng_random_bits.

    # LayerNorm, one-pass statistics: sum(y) and sum(y*y) together so the
    # (tm, P) tile is traversed once for stats and once for the normalize.
    inv_p = 1.0 / y.shape[-1]
    mean = jnp.sum(y, axis=-1, keepdims=True) * inv_p
    mean_sq = jnp.sum(y * y, axis=-1, keepdims=True) * inv_p
    var = jnp.maximum(mean_sq - mean * mean, 0.0)
    out = (y - mean) * lax.rsqrt(var + EPS) * gamma + beta

    o_ref[...] = out.astype(o_ref.dtype)


def _round_up(n, m):
    return ((n + m - 1) // m) * m


def _cdiv(a, b):
    return (a + b - 1) // b


def _pick_tm(B):
    """Row-tile size: even (>=2) grid steps for B>=16 (v7x 2-TC balance),
    single tile for tiny batches, ~512-row tiles for very large batches."""
    if B < 16:
        return _round_up(max(B, 1), 8)
    if B <= 1024:
        return _round_up(_cdiv(B, 2), 8)
    steps = _round_up(_cdiv(B, 512), 2)   # even step count, ~512-row tiles
    return _round_up(_cdiv(B, steps), 8)


def prepare_projection_head_params(w1, b1, w2, b2, gamma, beta, *,
                                   matmul_dtype=jnp.bfloat16):
    """One-time parameter prep (hoisted out of the per-call path).

    w1: (E, P), w2: (P, P) -- transposed relative to PyTorch nn.Linear storage.
    b1/b2/gamma/beta: (P,) or (1, P).
    Returns (w1_m, w2_m, packed_params) ready for projection_head_apply.
    """
    P = w1.shape[1]
    w1_m = jnp.asarray(w1, matmul_dtype)
    w2_m = jnp.asarray(w2, matmul_dtype)

    def _row(p):
        return jnp.asarray(p, jnp.float32).reshape(1, P)

    packed = jnp.concatenate([_row(b1), _row(b2), _row(gamma), _row(beta)],
                             axis=0)                       # (4, P), one DMA
    return (w1_m, w2_m, packed)


def projection_head_apply(x, prepared, *, tm=None, gelu_approx=True,
                          out_dtype=None):
    """Fused ProjectionHead forward. x: (B, E)."""
    w1_m, w2_m, params = prepared
    B, E = x.shape
    P = w1_m.shape[1]
    out_dtype = x.dtype if out_dtype is None else out_dtype

    # ---- pick the row tile ---------------------------------------------------
    if tm is None:
        tm = _pick_tm(B)
    tm = _round_up(tm, 8)
    B_pad = _round_up(B, tm)
    if B_pad != B:
        x = jnp.pad(x, ((0, B_pad - B), (0, 0)))
    grid = (B_pad // tm,)

    # ---- explicit VMEM budget (48 MiB cap: safe headroom on v7x's 64 MiB) ----
    wbytes = jnp.dtype(w1_m.dtype).itemsize
    est = (2 * tm * E * jnp.dtype(x.dtype).itemsize          # x tile, 2-buffered
           + 2 * tm * P * jnp.dtype(out_dtype).itemsize      # out tile, 2-buffered
           + (E * P + P * P) * wbytes                        # resident weights (1-buf)
           + 4 * P * 4                                       # packed params
           + 4 * tm * P * 4)                                 # f32 intermediates
    vmem_limit = int(min(max(2 * est, 32 * 1024 * 1024), 48 * 1024 * 1024))
    # Note: on v5e/v6e (128 MiB VMEM) a larger cap could be used for very big
    # E/P configs (query pltpu.get_tpu_info()); 48 MiB is ample for these sizes.

    full = lambda i: (0, 0)
    kernel = functools.partial(projection_head_kernel, gelu_approx=gelu_approx)

    out = pl.pallas_call(
        kernel,
        out_shape=jax.ShapeDtypeStruct((B_pad, P), out_dtype),
        grid_spec=pltpu.PrefetchScalarGridSpec(
            num_scalar_prefetch=0,
            grid=grid,
            in_specs=[
                pl.BlockSpec((tm, E), lambda i: (i, 0)),                 # x rows
                # Grid-invariant operands: single-buffered (no 2x weight VMEM).
                pl.BlockSpec((E, P), full, pipeline_mode=pl.Buffered(1)),  # W1
                pl.BlockSpec((P, P), full, pipeline_mode=pl.Buffered(1)),  # W2
                pl.BlockSpec((4, P), full, pipeline_mode=pl.Buffered(1)),  # params
            ],
            out_specs=pl.BlockSpec((tm, P), lambda i: (i, 0)),
        ),
        compiler_params=pltpu.CompilerParams(
            dimension_semantics=("parallel",),
            vmem_limit_bytes=vmem_limit,
        ),
    )(x, w1_m, w2_m, params)

    return out if B_pad == B else out[:B]


def projection_head(x, w1, b1, w2, b2, gamma, beta, *, tm=None,
                    matmul_dtype=jnp.bfloat16, gelu_approx=True,
                    out_dtype=None):
    """Convenience wrapper: prep + apply in one call (prep is re-done per call;
    for repeated inference call prepare_projection_head_params once)."""
    prepared = prepare_projection_head_params(
        w1, b1, w2, b2, gamma, beta, matmul_dtype=matmul_dtype)
    return projection_head_apply(x, prepared, tm=tm, gelu_approx=gelu_approx,
                                 out_dtype=out_dtype)


def reference(x, w1, b1, w2, b2, gamma, beta):
    projected = x @ w1 + jnp.reshape(b1, (1, -1))
    h = jax.nn.gelu(projected, approximate=False)
    y = h @ w2 + jnp.reshape(b2, (1, -1))
    y = y + projected
    mean = jnp.mean(y, axis=-1, keepdims=True)
    var = jnp.mean((y - mean) ** 2, axis=-1, keepdims=True)
    return ((y - mean) / jnp.sqrt(var + EPS)) * jnp.reshape(gamma, (1, -1)) \
        + jnp.reshape(beta, (1, -1))


if __name__ == "__main__":
    B, E, P = 64, 32, 256  # batch, embedding_dim, projection_dim (module default)

    key = jax.random.PRNGKey(0)
    kx, k1, kb1, k2, kb2 = jax.random.split(key, 5)

    x = jax.random.normal(kx, (B, E), dtype=jnp.float32)
    # Deterministic parameter init (uniform, roughly matching nn.Linear scale).
    w1 = jax.random.uniform(k1, (E, P), jnp.float32, -1.0, 1.0) / jnp.sqrt(E)
    b1 = jax.random.uniform(kb1, (1, P), jnp.float32, -1.0, 1.0) / jnp.sqrt(E)
    w2 = jax.random.uniform(k2, (P, P), jnp.float32, -1.0, 1.0) / jnp.sqrt(P)
    b2 = jax.random.uniform(kb2, (1, P), jnp.float32, -1.0, 1.0) / jnp.sqrt(P)
    gamma = jnp.ones((1, P), jnp.float32)   # nn.LayerNorm weight init
    beta = jnp.zeros((1, P), jnp.float32)   # nn.LayerNorm bias init

    ref = reference(x, w1, b1, w2, b2, gamma, beta)

    # f32 matmul path, exact erf GELU: tight structural check vs reference.
    prep_f32 = prepare_projection_head_params(w1, b1, w2, b2, gamma, beta,
                                              matmul_dtype=jnp.float32)
    out_f32 = jax.block_until_ready(
        projection_head_apply(x, prep_f32, gelu_approx=False))
    assert out_f32.shape == (B, P)
    assert jnp.allclose(out_f32, ref, atol=1e-4, rtol=1e-4), \
        f"f32 max err {jnp.max(jnp.abs(out_f32 - ref))}"

    # Default fast path: bf16 matmuls + tanh-approx GELU (EUP), prep hoisted.
    prep_bf16 = prepare_projection_head_params(w1, b1, w2, b2, gamma, beta,
                                               matmul_dtype=jnp.bfloat16)
    out_bf16 = jax.block_until_ready(projection_head_apply(x, prep_bf16))
    assert out_bf16.shape == (B, P)
    assert jnp.allclose(out_bf16, ref, atol=5e-2, rtol=5e-2), \
        f"bf16 max err {jnp.max(jnp.abs(out_bf16 - ref))}"

    # Odd, non-aligned shapes exercise the row-padding / full-extent-E path.
    B2, E2 = 20, 48
    x2 = jax.random.normal(jax.random.PRNGKey(1), (B2, E2), dtype=jnp.float32)
    w1b = jax.random.uniform(jax.random.PRNGKey(2), (E2, P), jnp.float32,
                             -1.0, 1.0) / jnp.sqrt(E2)
    out2 = jax.block_until_ready(
        projection_head(x2, w1b, b1, w2, b2, gamma, beta))
    ref2 = reference(x2, w1b, b1, w2, b2, gamma, beta)
    assert out2.shape == (B2, P)
    assert jnp.allclose(out2, ref2, atol=5e-2, rtol=5e-2), \
        f"odd-shape max err {jnp.max(jnp.abs(out2 - ref2))}"

    print("KERNEL_OK")
</pallas_src>

<mosaic_0001>
module attributes {stable_mosaic.version = 11 : i64} {
  func.func @projection_head_kernel(%arg0: i32, %arg1: memref<32x32xf32, #tpu.memory_space<vmem>>, %arg2: memref<32x256xf32, #tpu.memory_space<vmem>>, %arg3: memref<256x256xf32, #tpu.memory_space<vmem>>, %arg4: memref<4x256xf32, #tpu.memory_space<vmem>>, %arg5: memref<32x256xf32, #tpu.memory_space<vmem>>) attributes {dimension_semantics = [#tpu.dimension_semantics<parallel>], iteration_bounds = array<i64: 2>, scalar_prefetch = 0 : i64, scratch_operands = 0 : i64, tpu.core_type = #tpu.core_type<tc>, window_params = [{transform_indices = @transform_0, window_bounds = array<i64: 32, 32>}, {pipeline_mode = #tpu.pipeline_mode<synchronous>, transform_indices = @transform_1, window_bounds = array<i64: 32, 256>}, {pipeline_mode = #tpu.pipeline_mode<synchronous>, transform_indices = @transform_2, window_bounds = array<i64: 256, 256>}, {pipeline_mode = #tpu.pipeline_mode<synchronous>, transform_indices = @transform_3, window_bounds = array<i64: 4, 256>}, {transform_indices = @transform_4, window_bounds = array<i64: 32, 256>}]} {
    %c0 = arith.constant 0 : index
    %c0_0 = arith.constant 0 : index
    %0 = vector.load %arg1[%c0, %c0_0] : memref<32x32xf32, #tpu.memory_space<vmem>>, vector<32x32xf32>
    %c0_1 = arith.constant 0 : index
    %c0_2 = arith.constant 0 : index
    %1 = vector.load %arg4[%c0_1, %c0_2] : memref<4x256xf32, #tpu.memory_space<vmem>>, vector<4x256xf32>
    %2 = vector.extract_strided_slice %1 {offsets = [0, 0], sizes = [1, 256], strides = [1, 1]} : vector<4x256xf32> to vector<1x256xf32>
    %3 = vector.extract_strided_slice %1 {offsets = [1, 0], sizes = [1, 256], strides = [1, 1]} : vector<4x256xf32> to vector<1x256xf32>
    %4 = vector.extract_strided_slice %1 {offsets = [2, 0], sizes = [1, 256], strides = [1, 1]} : vector<4x256xf32> to vector<1x256xf32>
    %5 = vector.extract_strided_slice %1 {offsets = [3, 0], sizes = [1, 256], strides = [1, 1]} : vector<4x256xf32> to vector<1x256xf32>
    %c0_3 = arith.constant 0 : index
    %c0_4 = arith.constant 0 : index
    %6 = vector.load %arg2[%c0_3, %c0_4] : memref<32x256xf32, #tpu.memory_space<vmem>>, vector<32x256xf32>
    %cst = arith.constant dense<0.000000e+00> : vector<32x256xf32>
    %7 = tpu.matmul %0, %6, %cst {dimension_numbers = #tpu.dot_dimension_numbers<[1], [0], [0], [1], [0, 0, 1, 1], [], []>} : vector<32x32xf32>, vector<32x256xf32>, vector<32x256xf32> -> vector<32x256xf32>
    %8 = vector.broadcast %2 : vector<1x256xf32> to vector<32x256xf32>
    %9 = arith.addf %7, %8 : vector<32x256xf32>
    %cst_5 = arith.constant 5.000000e-01 : f32
    %10 = vector.broadcast %cst_5 : f32 to vector<32x256xf32>
    %11 = arith.mulf %10, %9 : vector<32x256xf32>
    %cst_6 = arith.constant 0.707106769 : f32
    %12 = vector.broadcast %cst_6 : f32 to vector<32x256xf32>
    %13 = arith.mulf %9, %12 : vector<32x256xf32>
    %14 = math.erf %13 : vector<32x256xf32>
    %cst_7 = arith.constant 1.000000e+00 : f32
    %15 = vector.broadcast %cst_7 : f32 to vector<32x256xf32>
    %16 = arith.addf %15, %14 : vector<32x256xf32>
    %17 = arith.mulf %11, %16 : vector<32x256xf32>
    %c0_8 = arith.constant 0 : index
    %c0_9 = arith.constant 0 : index
    %18 = vector.load %arg3[%c0_8, %c0_9] : memref<256x256xf32, #tpu.memory_space<vmem>>, vector<256x256xf32>
    %cst_10 = arith.constant dense<0.000000e+00> : vector<32x256xf32>
    %19 = tpu.matmul %17, %18, %cst_10 {dimension_numbers = #tpu.dot_dimension_numbers<[1], [0], [0], [1], [0, 0, 1, 1], [], []>} : vector<32x256xf32>, vector<256x256xf32>, vector<32x256xf32> -> vector<32x256xf32>
    %20 = vector.broadcast %3 : vector<1x256xf32> to vector<32x256xf32>
    %21 = arith.addf %9, %20 : vector<32x256xf32>
    %22 = arith.addf %19, %21 : vector<32x256xf32>
    %cst_11 = arith.constant dense<0.000000e+00> : vector<32xf32>
    %23 = vector.multi_reduction <add>, %22, %cst_11 [1] : vector<32x256xf32> to vector<32xf32>
    %24 = vector.shape_cast %23 : vector<32xf32> to vector<32x1xf32>
    %cst_12 = arith.constant 3.906250e-03 : f32
    %25 = vector.broadcast %cst_12 : f32 to vector<32x1xf32>
    %26 = arith.mulf %24, %25 : vector<32x1xf32>
    %27 = arith.mulf %22, %22 : vector<32x256xf32>
    %cst_13 = arith.constant dense<0.000000e+00> : vector<32xf32>
    %28 = vector.multi_reduction <add>, %27, %cst_13 [1] : vector<32x256xf32> to vector<32xf32>
    %29 = vector.shape_cast %28 : vector<32xf32> to vector<32x1xf32>
    %cst_14 = arith.constant 3.906250e-03 : f32
    %30 = vector.broadcast %cst_14 : f32 to vector<32x1xf32>
    %31 = arith.mulf %29, %30 : vector<32x1xf32>
    %32 = arith.mulf %26, %26 : vector<32x1xf32>
    %33 = arith.subf %31, %32 : vector<32x1xf32>
    %cst_15 = arith.constant 0.000000e+00 : f32
    %34 = vector.broadcast %cst_15 : f32 to vector<32x1xf32>
    %35 = arith.maximumf %33, %34 : vector<32x1xf32>
    %36 = vector.broadcast %26 : vector<32x1xf32> to vector<32x256xf32>
    %37 = arith.subf %22, %36 : vector<32x256xf32>
    %cst_16 = arith.constant 9.99999974E-6 : f32
    %38 = vector.broadcast %cst_16 : f32 to vector<32x1xf32>
    %39 = arith.addf %35, %38 : vector<32x1xf32>
    %40 = math.rsqrt %39 : vector<32x1xf32>
    %41 = vector.broadcast %40 : vector<32x1xf32> to vector<32x256xf32>
    %42 = arith.mulf %37, %41 : vector<32x256xf32>
    %43 = vector.broadcast %4 : vector<1x256xf32> to vector<32x256xf32>
    %44 = arith.mulf %42, %43 : vector<32x256xf32>
    %45 = vector.broadcast %5 : vector<1x256xf32> to vector<32x256xf32>
    %46 = arith.addf %44, %45 : vector<32x256xf32>
    %c0_17 = arith.constant 0 : index
    %c0_18 = arith.constant 0 : index
    %47 = vector.load %arg5[%c0_17, %c0_18] : memref<32x256xf32, #tpu.memory_space<vmem>>, vector<32x256xf32>
    tpu.vector_store %arg5[%c0_17, %c0_18], %46 {strides = array<i32>} : memref<32x256xf32, #tpu.memory_space<vmem>>, vector<32x256xf32>,
    return
  }
  func.func @transform_0(%arg0: i32) -> (i32, i32) {
    %c0_i32 = arith.constant 0 : i32
    %c0_i32_0 = arith.constant 0 : i32
    return %arg0, %c0_i32 : i32, i32
  }
  func.func @transform_1(%arg0: i32) -> (i32, i32) {
    %c0_i32 = arith.constant 0 : i32
    %c0_i32_0 = arith.constant 0 : i32
    %c0_i32_1 = arith.constant 0 : i32
    return %c0_i32, %c0_i32_0 : i32, i32
  }
  func.func @transform_2(%arg0: i32) -> (i32, i32) {
    %c0_i32 = arith.constant 0 : i32
    %c0_i32_0 = arith.constant 0 : i32
    %c0_i32_1 = arith.constant 0 : i32
    return %c0_i32, %c0_i32_0 : i32, i32
  }
  func.func @transform_3(%arg0: i32) -> (i32, i32) {
    %c0_i32 = arith.constant 0 : i32
    %c0_i32_0 = arith.constant 0 : i32
    %c0_i32_1 = arith.constant 0 : i32
    return %c0_i32, %c0_i32_0 : i32, i32
  }
  func.func @transform_4(%arg0: i32) -> (i32, i32) {
    %c0_i32 = arith.constant 0 : i32
    %c0_i32_0 = arith.constant 0 : i32
    return %arg0, %c0_i32 : i32, i32
  }
}

</mosaic_0001>

<bundles_post_ra>
// kernel: tpu_custom_call.1
= control target key start
LH: loop header
LB: loop body
LE: loop exit
PB: predicated region body
PF: predicated region fallthrough
CT: control target
= control target key end

     0   :  { %9 = vsyncpa [#allocation3], 0  ;;  %s1801_s0 = inlined_call_operand.vmem [shape: f32[64,32], index: 0, kind: input, shape index: {}]   ;;  %s1802_s1 = inlined_call_operand.vmem [shape: f32[32,256], index: 1, kind: input, shape index: {}]   ;;  %s1803_s2 = inlined_call_operand.hbm [shape: f32[256,256], index: 2, kind: input, shape index: {}]   ;;  %s1804_s3 = inlined_call_operand.vmem [shape: f32[4,256], index: 3, kind: input, shape index: {}]   ;;  %s1805_s4 = inlined_call_operand.hbm [shape: f32[64,256], index: 4, kind: output, shape index: {}]  }
   0x1   :  { %10 = vsyncpa [#allocation4], 0 }
   0x2   :  { %12 = vsyncpa [#allocation4 + $0x1], 0  ;;  %s1332_s15 = smov 0   ;;  %s1334_s16 = smov 0  }
   0x3   :  { %s1336_s17 = smov 0   ;;  %s1338_s18 = smov 0  }
   0x4 LB: > { %s1353_s19 = sadd.s32 4294967295, %s1300_s18   ;;  %s1092_s20 = sadd.s32 4294967294, %s1300_s18   ;;  %s1300_s18 = sphi %s1338_s18, %s1817_s18   ;;  %s1296_s17 = sphi %s1336_s17, %s1816_s17   ;;  %s1292_s16 = sphi %s1334_s16, %s1815_s16   ;;  %s1288_s15 = sphi %s1332_s15, %s1814_s15  }
   0x5   : > { %s1357_s21 = sadd.s32 1, %s1300_s18   ;;  %s114_s22 = sadd.s32 1, %s1296_s17 }
   0x6   : > { %s111_s23 = ssub.s32 %s1300_s18, %s1357_s21  ;;  %p124_p0 = scmp.ne.s32.totalorder %s1296_s17, %s1292_s16 }
   0x7   : > { %p112_p1 = scmp.eq.s32.totalorder %s111_s23, 0  ;;  %p125_p2 = scmp.eq.s32.totalorder %s1353_s19, 1 }
   0x8   : > { %p130_p3 = scmp.ne.s32.totalorder %s1292_s16, %s1288_s15  ;;  %p131_p4 = scmp.eq.s32.totalorder %s1092_s20, 1 }
   0x9   : > { %s1368_s24 = scalar_select %p112_p1, %s1296_s17, %s114_s22  }
   0xa   : > { %p1370_p5 = por %p125_p2, %p124_p0  ;;  %p1374_p6 = por %p131_p4, %p130_p3 }
   0xb   : > { %p1093_p7 = scmp.ge.s32.totalorder %s1300_s18, 1  ;;  %p138_p8 = scmp.lt.s32.totalorder %s1300_s18, 3 }
   0xc   : > { %p1139_p9 = scmp.eq.s32.totalorder %s1353_s19, 0  ;;  %s152_s29 = sshll.u32 %s1803_s2, 4  ;;  %s153_s29 = int_to_ptr.hbm [resolvable:$true] %s152_s29 }
   0xd   : > { %p139_p10 = pnand %p1093_p7, %p138_p8  ;;  %s1302_s30 = smov [#allocation2]  }
   0xe   : > { %s154_s5 = sshll.u32 %s1302_s30, 4  ;;  %s1303_s6 = smov 256   ;;  %s155_s5 = int_to_ptr.vmem [resolvable:$true] %s154_s5 }
   0xf   : > { %p1131_p11 = pneg %p139_p10  ;;  %s1304_s7 = smov 16  }
  0x10   : > { %182 = sbr.rel (%p139_p10) target bundleno = 562 (0x232), region = 36 }
  0x11   : > { %p1132_p12 = pnand %p1139_p9, %p1131_p11 }
  0x13   : > { %1134 = dma.hbm_to_vmem [thread:$0]  (!%p1132_p12), %s153_s29, 8192, %s155_s5, [#allocation3], %s1303_s6, %s1303_s6, %s1304_s7  }
  0x15   : > { %1279 = dma.done.wait (%p1139_p9), [#allocation3], 8192  }
  0x16   : > { %1281 = vsyncadd (%p1139_p9), [#allocation3], 4294959104  ;;  %s1099_s8 = sshll.u32 %s1353_s19, 2  ;;  %v227_v0 = vld [vmem:[%s1802_s1 + $0x30] sm:$0xff]  ;;  %v228_v1 = vld [vmem:[%s1802_s1 + $0x38] sm:$0xff]  ;;  %vm236_vm0 = vcmask 261120  }
  0x17   : > { %p210_p13 = scmp.lt.s32.totalorder %s1099_s8, 7  ;;  %v225_v2 = vld [vmem:[%s1802_s1 + $0x20] sm:$0xff]  ;;  %261 = vmatpush.msra.mxu0 %v227_v0  ;;  %290 = vmatpush.msra.mxu1 %v228_v1  ;;  %v226_v3 = vld [vmem:[%s1802_s1 + $0x28] sm:$0xff]  ;;  %v223_v4 = vld [vmem:[%s1802_s1 + $0x10] sm:$0xff]  ;;  %s206_s22 = sand.u32 1, %s1292_s16  }
  0x18   : > { %v224_v5 = vld [vmem:[%s1802_s1 + $0x18] sm:$0xff]  ;;  %v221_v6 = vld [vmem:[%s1802_s1] sm:$0xff]  ;;  %v222_v7 = vld [vmem:[%s1802_s1 + $0x8] sm:$0xff]  ;;  %s1098_s23 = sshll.u32 %s206_s22, 6  ;;  %s1124_s28 = sshll.u32 %s1353_s19, 6 }
  0x19   : > { %s1819_s8 = smov (!%p210_p13, %s1099_s8), 7  ;;  %262 = vmatpush.msra.mxu0 %v225_v2  ;;  %291 = vmatpush.msra.mxu1 %v226_v3  ;;  %v220_v12 = vld [vmem:[%s1804_s3] sm:$0xff]  ;;  %v689_v13 = vld [vmem:[#allocation2 + $0xf0] sm:$0xff]  ;;  %v690_v15 = vld [vmem:[#allocation2 + $0xf8] sm:$0xff]  ;;  %s1739_s27 = scalar_lea.vmem [#allocation5], %s1098_s23 }
  0x1a   : > { %s1100_s9 = sshll.u32 %s1819_s8, 3  ;;  %v721_v14 = vld [vmem:[#allocation2 + $0x1f0] sm:$0xff]  ;;  %737 = vmatpush.msra.mxu2 %v689_v13  ;;  %v722_v16 = vld [vmem:[#allocation2 + $0x1f8] sm:$0xff]  ;;  %v687_v17 = vld [vmem:[#allocation2 + $0xe0] sm:$0xff]  ;;  %v230_v20 = vperm.slane %v220_v12, 0  ;;  %v231_v21 = vperm.slane %v220_v12, 4  ;;  %s1014_s5 = scalar_lea.hbm %s1805_s4, %s1124_s28 }
  0x1b   : > { %s213_s7 = scalar_lea.vmem %s1801_s0, %s1100_s9  ;;  %263 = vmatpush.msra.mxu0 %v223_v4  ;;  %292 = vmatpush.msra.mxu1 %v224_v5  ;;  %v719_v18 = vld [vmem:[#allocation2 + $0x1e0] sm:$0xff]  ;;  %v688_v19 = vld [vmem:[#allocation2 + $0xe8] sm:$0xff]  ;;  %v685_v23 = vld [vmem:[#allocation2 + $0xd0] sm:$0xff]  ;;  %s1015_s6 = sshll.u32 %s1739_s27, 4  ;;  %s1016_s6 = int_to_ptr.vmem [resolvable:$true] %s1015_s6 }
  0x1c   : > { %v216_v8 = vld [vmem:[%s213_s7] sm:$0xff]  ;;  %v217_v9 = vld [vmem:[%s213_s7 + $0x8] sm:$0xff]  ;;  %v218_v10 = vld [vmem:[%s213_s7 + $0x10] sm:$0xff]  ;;  %766 = vmatpush.msra.mxu3 %v721_v14  ;;  %738 = vmatpush.msra.mxu2 %v687_v17  ;;  %v1421_v30 = vperm.slane %v230_v20, 0  ;;  %v1423_v31 = vperm.slane %v231_v21, 0  ;;  %s1017_s19 = sshll.u32 %s1014_s5, 4  ;;  %s1018_s19 = int_to_ptr.hbm [resolvable:$true] %s1017_s19 }
  0x1d   : > { %264 = vmatpush.msra.mxu0 %v221_v6  ;;  %293 = vmatpush.msra.mxu1 %v222_v7  ;;  %v219_v11 = vld [vmem:[%s213_s7 + $0x18] sm:$0xff]  ;;  %v720_v22 = vld [vmem:[#allocation2 + $0x1e8] sm:$0xff]  ;;  %v717_v24 = vld [vmem:[#allocation2 + $0x1d0] sm:$0xff]  ;;  %s1002_s7 = scalar_lea.sflag [#allocation4], %s206_s22  ;;  %s1248_s8 = sshra.s32 %s1018_s19, 4  ;;  %s1249_s8 = int_to_ptr.hbm [resolvable:$true] %s1248_s8 }
  0x1e   : > { %1101 = vmatmul.msk.f32.vlgmr.msra.gmra.mxu0 %vm236_vm0, %v216_v8  ;;  %1105 = vmatmul.msk.f32.vlgmr.msra.gmra.mxu1 %vm236_vm0, %v216_v8  ;;  %v686_v25 = vld [vmem:[#allocation2 + $0xd8] sm:$0xff]  ;;  %v683_v27 = vld [vmem:[#allocation2 + $0xc0] sm:$0xff]  ;;  %v684_v29 = vld [vmem:[#allocation2 + $0xc8] sm:$0xff]  ;;  %s1250_s10 = scalar_lea.hbm %s1249_s8, 64  ;;  %s1254_s9 = scalar_lea.hbm %s1805_s4, 128 }
  0x1f   : > { %795 = vmatpush.msrb.mxu0 %v690_v15  ;;  %824 = vmatpush.msrb.mxu1 %v722_v16  ;;  %v718_v26 = vld [vmem:[#allocation2 + $0x1d8] sm:$0xff]  ;;  %v715_v28 = vld [vmem:[#allocation2 + $0x1c0] sm:$0xff]  ;;  %v716_v32 = vld [vmem:[#allocation2 + $0x1c8] sm:$0xff]  ;;  %p1251_p0 = scmp.ne.s32.totalorder %s1249_s8, %s1250_s10  ;;  %p1255_p3 = scmp.lt.s32.totalorder %s1249_s8, %s1805_s4 }
  0x20   : > { %767 = vmatpush.msra.mxu3 %v719_v18  ;;  %739 = vmatpush.msra.mxu2 %v685_v23  ;;  %v681_v33 = vld [vmem:[#allocation2 + $0xb0] sm:$0xff]  ;;  %v682_v35 = vld [vmem:[#allocation2 + $0xb8] sm:$0xff]  ;;  %v679_v37 = vld [vmem:[#allocation2 + $0xa0] sm:$0xff]  ;;  %p1256_p4 = scmp.lt.s32.totalorder %s1254_s9, %s1250_s10 }
  0x21   : > { %796 = vmatpush.msrb.mxu0 %v688_v19  ;;  %825 = vmatpush.msrb.mxu1 %v720_v22  ;;  %v713_v34 = vld [vmem:[#allocation2 + $0x1b0] sm:$0xff]  ;;  %v714_v36 = vld [vmem:[#allocation2 + $0x1b8] sm:$0xff]  ;;  %v711_v38 = vld [vmem:[#allocation2 + $0x1a0] sm:$0xff]  ;;  %p1252_p1 = pnand %p1251_p0, %p1370_p5 }
  0x22   : > { %768 = vmatpush.msra.mxu3 %v717_v24  ;;  %740 = vmatpush.msra.mxu2 %v683_v27  ;;  %v680_v41 = vld [vmem:[#allocation2 + $0xa8] sm:$0xff]  ;;  %v677_v43 = vld [vmem:[#allocation2 + $0x90] sm:$0xff]  ;;  %v678_v47 = vld [vmem:[#allocation2 + $0x98] sm:$0xff]  ;;  %p1257_p7 = por %p1256_p4, %p1255_p3 }
  0x23   : > { %797 = vmatpush.msrb.mxu0 %v686_v25  ;;  %826 = vmatpush.msrb.mxu1 %v718_v26  ;;  %v712_v42 = vld [vmem:[#allocation2 + $0x1a8] sm:$0xff]  ;;  %v709_v46 = vld [vmem:[#allocation2 + $0x190] sm:$0xff]  ;;  %v710_v48 = vld [vmem:[#allocation2 + $0x198] sm:$0xff]  ;;  %p1253_p2 = pneg %p1252_p1 }
  0x24   : > { %769 = vmatpush.msra.mxu3 %v715_v28  ;;  %741 = vmatpush.msra.mxu2 %v681_v33  ;;  %v675_v49 = vld [vmem:[#allocation2 + $0x80] sm:$0xff]  ;;  %v676_v53 = vld [vmem:[#allocation2 + $0x88] sm:$0xff]  ;;  %v673_v55 = vld [vmem:[#allocation2 + $0x70] sm:$0xff] }
  0x25   : > { %798 = vmatpush.msrb.mxu0 %v684_v29  ;;  %827 = vmatpush.msrb.mxu1 %v716_v32  ;;  %v707_v50 = vld [vmem:[#allocation2 + $0x180] sm:$0xff]  ;;  %v708_v54 = vld [vmem:[#allocation2 + $0x188] sm:$0xff]  ;;  %v705_v56 = vld [vmem:[#allocation2 + $0x170] sm:$0xff]  ;;  %p1258_p8 = pnand %p1257_p7, %p1253_p2 }
  0x26   : > { %1102 = vmatmul.msk.f32.gmra.mxu0 %vm236_vm0, %v217_v9  ;;  %1106 = vmatmul.msk.f32.gmra.mxu1 %vm236_vm0, %v217_v9  ;;  %v674_v58 = vld [vmem:[#allocation2 + $0x78] sm:$0xff]  ;;  %v671_v61 = vld [vmem:[#allocation2 + $0x60] sm:$0xff]  ;;  %v672_v0 = vld [vmem:[#allocation2 + $0x68] sm:$0xff] }
  0x27   : > { %770 = vmatpush.msra.mxu3 %v713_v34  ;;  %799 = vmatpush.msrb.mxu0 %v682_v35  ;;  %v706_v59 = vld [vmem:[#allocation2 + $0x178] sm:$0xff]  ;;  %v703_v62 = vld [vmem:[#allocation2 + $0x160] sm:$0xff]  ;;  %v704_v1 = vld [vmem:[#allocation2 + $0x168] sm:$0xff] }
  0x28   : > { %828 = vmatpush.msrb.mxu1 %v714_v36  ;;  %742 = vmatpush.msra.mxu2 %v679_v37  ;;  %v669_v4 = vld [vmem:[#allocation2 + $0x50] sm:$0xff]  ;;  %v670_v7 = vld [vmem:[#allocation2 + $0x58] sm:$0xff]  ;;  %v699_v12 = vld [vmem:[#allocation2 + $0x140] sm:$0xff] }
  0x29   : > { %771 = vmatpush.msra.mxu3 %v711_v38  ;;  %800 = vmatpush.msrb.mxu0 %v680_v41  ;;  %v701_v5 = vld [vmem:[#allocation2 + $0x150] sm:$0xff]  ;;  %v702_v8 = vld [vmem:[#allocation2 + $0x158] sm:$0xff]  ;;  %v668_v15 = vld [vmem:[#allocation2 + $0x48] sm:$0xff] }
  0x2a   : > { %829 = vmatpush.msrb.mxu1 %v712_v42  ;;  %743 = vmatpush.msra.mxu2 %v677_v43  ;;  %v700_v16 = vld [vmem:[#allocation2 + $0x148] sm:$0xff]  ;;  %v665_v17 = vld [vmem:[#allocation2 + $0x30] sm:$0xff]  ;;  %v666_v21 = vld [vmem:[#allocation2 + $0x38] sm:$0xff] }
  0x2b   : > { %772 = vmatpush.msra.mxu3 %v709_v46  ;;  %801 = vmatpush.msrb.mxu0 %v678_v47  ;;  %v697_v18 = vld [vmem:[#allocation2 + $0x130] sm:$0xff]  ;;  %v698_v22 = vld [vmem:[#allocation2 + $0x138] sm:$0xff]  ;;  %v663_v23 = vld [vmem:[#allocation2 + $0x20] sm:$0xff] }
  0x2c   : > { %830 = vmatpush.msrb.mxu1 %v710_v48  ;;  %744 = vmatpush.msra.mxu2 %v675_v49  ;;  %v695_v25 = vld [vmem:[#allocation2 + $0x120] sm:$0xff]  ;;  %v664_v26 = vld [vmem:[#allocation2 + $0x28] sm:$0xff]  ;;  %v661_v34 = vld [vmem:[#allocation2 + $0x10] sm:$0xff] }
  0x2d   : > { %773 = vmatpush.msra.mxu3 %v707_v50  ;;  %802 = vmatpush.msrb.mxu0 %v676_v53  ;;  %v696_v33 = vld [vmem:[#allocation2 + $0x128] sm:$0xff]  ;;  %v693_v35 = vld [vmem:[#allocation2 + $0x110] sm:$0xff]  ;;  %v662_v43 = vld [vmem:[#allocation2 + $0x18] sm:$0xff] }
  0x2e   : > { %1103 = vmatmul.msk.f32.gmra.mxu0 %vm236_vm0, %v218_v10  ;;  %1107 = vmatmul.msk.f32.gmra.mxu1 %vm236_vm0, %v218_v10  ;;  %v694_v46 = vld [vmem:[#allocation2 + $0x118] sm:$0xff]  ;;  %v659_v49 = vld [vmem:[#allocation2] sm:$0xff] }
  0x2f   : > { %831 = vmatpush.msrb.mxu1 %v708_v54  ;;  %745 = vmatpush.msra.mxu2 %v673_v55  ;;  %v691_v50 = vld [vmem:[#allocation2 + $0x100] sm:$0xff] }
  0x30   : > { %774 = vmatpush.msra.mxu3 %v705_v56  ;;  %803 = vmatpush.msrb.mxu0 %v674_v58  ;;  %v692_v58 = vld [vmem:[#allocation2 + $0x108] sm:$0xff] }
  0x31   : > { %832 = vmatpush.msrb.mxu1 %v706_v59  ;;  %746 = vmatpush.msra.mxu2 %v671_v61 }
  0x32   : > { %775 = vmatpush.msra.mxu3 %v703_v62  ;;  %804 = vmatpush.msrb.mxu0 %v672_v0 }
  0x33   : > { %833 = vmatpush.msrb.mxu1 %v704_v1  ;;  %747 = vmatpush.msra.mxu2 %v669_v4 }
  0x34   : > { %776 = vmatpush.msra.mxu3 %v701_v5  ;;  %805 = vmatpush.msrb.mxu0 %v670_v7 }
  0x35   : > { %834 = vmatpush.msrb.mxu1 %v702_v8 }
  0x36   : > { %1104 = vmatmul.msk.f32.gmra.mxu0 %vm236_vm0, %v219_v11  ;;  %1108 = vmatmul.msk.f32.gmra.mxu1 %vm236_vm0, %v219_v11  ;;  %v667_v11 = vld [vmem:[#allocation2 + $0x40] sm:$0xff] }
  0x37   : > { %748 = vmatpush.msra.mxu2 %v667_v11  ;;  %777 = vmatpush.msra.mxu3 %v699_v12 }
  0x38   : > { %806 = vmatpush.msrb.mxu0 %v668_v15  ;;  %835 = vmatpush.msrb.mxu1 %v700_v16 }
  0x39   : > { %749 = vmatpush.msra.mxu2 %v665_v17  ;;  %778 = vmatpush.msra.mxu3 %v697_v18 }
  0x3a   : > { %807 = vmatpush.msrb.mxu0 %v666_v21  ;;  %836 = vmatpush.msrb.mxu1 %v698_v22 }
  0x3b   : > { %750 = vmatpush.msra.mxu2 %v663_v23  ;;  %779 = vmatpush.msra.mxu3 %v695_v25 }
  0x3c   : > { %808 = vmatpush.msrb.mxu0 %v664_v26  ;;  %837 = vmatpush.msrb.mxu1 %v696_v33 }
  0x3d   : > { %751 = vmatpush.msra.mxu2 %v661_v34  ;;  %780 = vmatpush.msra.mxu3 %v693_v35 }
  0x3e   : > { %809 = vmatpush.msrb.mxu0 %v662_v43  ;;  %838 = vmatpush.msrb.mxu1 %v694_v46 }
  0x3f   : > { %752 = vmatpush.msra.mxu2 %v659_v49  ;;  %781 = vmatpush.msra.mxu3 %v691_v50 }
  0x40   : > { %839 = vmatpush.msrb.mxu1 %v692_v58 }
  0x9b   : > { %v266_v39 = vpop.f32.mrf.mxu0  ;;  %v295_v40 = vpop.f32.mrf.mxu1 }
  0x9c   : > { %v1426_v44 = vadd.f32 %v266_v39, %v1421_v30  ;;  %v1429_v45 = vadd.f32 %v295_v40, %v1423_v31 }
  0x9e   : > { %v1432_v51 = vmul.f32 0.70710677, %v1426_v44  ;;  %v1435_v52 = vmul.f32 0.70710677, %v1429_v45  ;;  %v1528_v58 = vmul.f32 0.5, %v1426_v44 }
  0xa0   : > { %v323_v57 = vmul.f32 %v1432_v51, %v1432_v51  ;;  %v363_v60 = vmul.f32 %v1435_v52, %v1435_v52 }
  0xa2   : > { %v1441_v63 = vmin.f32 %v323_v57, 16.0  ;;  %v1447_v10 = vmin.f32 %v363_v60, 16.0  ;;  %v660_v57 = vld [vmem:[#allocation2 + $0x8] sm:$0xff] }
  0xa3   : > { %v269_v2 = vpop.f32.mrf.mxu0  ;;  %v298_v3 = vpop.f32.mrf.mxu1  ;;  %810 = vmatpush.msrb.mxu0 %v660_v57 }
  0xa4   : > { %v1444_v6 = vadd.f32 %v269_v2, %v1421_v30  ;;  %v325_v9 = vmul.f32 2.1237322e-06, %v1441_v63  ;;  %v336_v13 = vmul.f32 3.8918573e-05, %v1441_v63  ;;  %v365_v28 = vmul.f32 2.1237322e-06, %v1447_v10 }
  0xa5   : > { %v376_v29 = vmul.f32 3.8918573e-05, %v1447_v10  ;;  %v1462_v42 = vadd.f32 %v298_v3, %v1423_v31 }
  0xa6   : > { %v1451_v14 = vmul.f32 0.70710677, %v1444_v6  ;;  %v326_v19 = vadd.f32 0.00028619796, %v325_v9  ;;  %v337_v24 = vadd.f32 0.001143296, %v336_v13 }
  0xa7   : > { %v366_v40 = vadd.f32 0.00028619796, %v365_v28  ;;  %v377_v41 = vadd.f32 0.001143296, %v376_v29  ;;  %v1471_v1 = vmul.f32 0.70710677, %v1462_v42 }
  0xa8   : > { %v403_v20 = vmul.f32 %v1451_v14, %v1451_v14  ;;  %v327_v27 = vmul.f32 %v326_v19, %v1441_v63  ;;  %v338_v36 = vmul.f32 %v337_v24, %v1441_v63 }
  0xa9   : > { %v367_v54 = vmul.f32 %v366_v40, %v1447_v10  ;;  %v378_v55 = vmul.f32 %v377_v41, %v1447_v10  ;;  %v443_v21 = vmul.f32 %v1471_v1, %v1471_v1 }
  0xaa   : > { %v1458_v32 = vmin.f32 %v403_v20, 16.0  ;;  %v328_v39 = vadd.f32 0.0036580483, %v327_v27  ;;  %v339_v47 = vadd.f32 0.014752088, %v338_v36 }
  0xab   : > { %v272_v37 = vpop.f32.mrf.mxu0  ;;  %v301_v38 = vpop.f32.mrf.mxu1  ;;  %v368_v62 = vadd.f32 0.0036580483, %v367_v54  ;;  %v379_v0 = vadd.f32 0.014752088, %v378_v55 }
  0xac   : > { %v405_v48 = vmul.f32 2.1237322e-06, %v1458_v32  ;;  %v329_v53 = vmul.f32 %v328_v39, %v1441_v63  ;;  %v416_v56 = vmul.f32 3.8918573e-05, %v1458_v32  ;;  %v340_v59 = vmul.f32 %v339_v47, %v1441_v63 }
  0xad   : > { %v1474_v2 = vadd.f32 %v272_v37, %v1421_v30  ;;  %v369_v7 = vmul.f32 %v368_v62, %v1447_v10  ;;  %v380_v8 = vmul.f32 %v379_v0, %v1447_v10  ;;  %v1481_v11 = vadd.f32 %v301_v38, %v1423_v31 }
  0xae   : > { %v406_v60 = vadd.f32 0.00028619796, %v405_v48  ;;  %v330_v61 = vadd.f32 0.05243302, %v329_v53  ;;  %v341_v3 = vadd.f32 0.112945676, %v340_v59 }
  0xaf   : > { %v417_v9 = vadd.f32 0.001143296, %v416_v56  ;;  %v370_v18 = vadd.f32 0.05243302, %v369_v7  ;;  %v381_v19 = vadd.f32 0.112945676, %v380_v8 }
  0xb0   : > { %v407_v4 = vmul.f32 %v406_v60, %v1458_v32  ;;  %v331_v5 = vmul.f32 %v330_v61, %v1441_v63  ;;  %v342_v12 = vmul.f32 %v341_v3, %v1441_v63  ;;  %v1492_v25 = vmul.f32 0.70710677, %v1474_v2 }
  0xb1   : > { %v418_v20 = vmul.f32 %v417_v9, %v1458_v32  ;;  %v371_v26 = vmul.f32 %v370_v18, %v1447_v10  ;;  %v382_v27 = vmul.f32 %v381_v19, %v1447_v10  ;;  %v1497_v29 = vmul.f32 0.70710677, %v1481_v11 }
  0xb2   : > { %v408_v13 = vadd.f32 0.0036580483, %v407_v4  ;;  %v332_v17 = vadd.f32 0.18741608, %v331_v5  ;;  %v343_v23 = vadd.f32 0.4994258, %v342_v12 }
  0xb3   : > { %v275_v15 = vpop.f32.mrf.mxu0  ;;  %v304_v16 = vpop.f32.mrf.mxu1  ;;  %v419_v28 = vadd.f32 0.014752088, %v418_v20  ;;  %v372_v36 = vadd.f32 0.18741608, %v371_v26  ;;  %v383_v37 = vadd.f32 0.4994258, %v382_v27 }
  0xb4   : > { %v1488_v22 = vadd.f32 %v275_v15, %v1421_v30  ;;  %v409_v24 = vmul.f32 %v408_v13, %v1458_v32  ;;  %v1500_v33 = vadd.f32 %v304_v16, %v1423_v31  ;;  %v333_v30 = vmul.f32 %v332_v17, %v1441_v63 }
  0xb5   : > { %v344_v34 = vmul.f32 %v343_v23, %v1441_v63  ;;  %v420_v38 = vmul.f32 %v419_v28, %v1458_v32  ;;  %v1508_v39 = vmin.f32 %v443_v21, 16.0  ;;  %v384_v43 = vmul.f32 %v383_v37, %v1447_v10 }
  0xb6   : > { %v1505_v35 = vmul.f32 0.70710677, %v1488_v22  ;;  %v410_v41 = vadd.f32 0.05243302, %v409_v24  ;;  %v483_v31 = vmul.f32 %v1492_v25, %v1492_v25  ;;  %v523_v63 = vmul.f32 %v1497_v29, %v1497_v29 }
  0xb7   : > { %v345_v40 = vadd.f32 1.0, %v344_v34  ;;  %v421_v46 = vadd.f32 0.112945676, %v420_v38  ;;  %v373_v47 = vmul.f32 %v372_v36, %v1447_v10  ;;  %v1519_v49 = vmul.f32 0.70710677, %v1500_v33 }
  0xb8   : > { %v563_v48 = vmul.f32 %v1505_v35, %v1505_v35  ;;  %v334_v50 = vadd.f32 1.1283791, %v333_v30  ;;  %v1521_v53 = vadd.f32 1.0, %v384_v43  ;;  %v411_v54 = vmul.f32 %v410_v41, %v1458_v32 }
  0xb9   : > { %1179 = vrcp.f32 %v345_v40  ;;  %v422_v55 = vmul.f32 %v421_v46, %v1458_v32  ;;  %v445_v56 = vmul.f32 2.1237322e-06, %v1508_v39  ;;  %v456_v57 = vmul.f32 3.8918573e-05, %v1508_v39 }
  0xba   : > { %v355_v10 = vand.u32 2147483647, %v345_v40  ;;  %v1531_v59 = vmul.f32 0.5, %v1429_v45  ;;  %1181 = vrcp.f32 %v1521_v53  ;;  %v1534_v60 = vmin.f32 %v483_v31, 16.0 }
  0xbb   : > { %v1536_v61 = vmin.f32 %v523_v63, 16.0  ;;  %v357_v62 = vand.u32 2147483648, %v345_v40  ;;  %v374_v0 = vadd.f32 1.1283791, %v373_v47  ;;  %v1540_v3 = vmul.f32 %v1519_v49, %v1519_v49 }
  0xbc   : > { %v423_v4 = vadd.f32 0.4994258, %v422_v55  ;;  %v446_v5 = vadd.f32 0.00028619796, %v445_v56  ;;  %v457_v7 = vadd.f32 0.001143296, %v456_v57  ;;  %v335_v12 = vmul.f32 %v334_v50, %v1432_v51 }
  0xbd   : > { %v1542_v9 = vmin.f32 %v563_v48, 16.0  ;;  %vm351_vm1 = vweird.f32 %v345_v40  ;;  %v412_v13 = vadd.f32 0.18741608, %v411_v54  ;;  %vm1545_vm2 = vcmp.eq.f32.partialorder %v355_v10, 8.507059e+37 }
  0xbe   : > { %v424_v17 = vmul.f32 %v423_v4, %v1458_v32  ;;  %v447_v18 = vmul.f32 %v446_v5, %v1508_v39  ;;  %v358_v19 = vor.u32 1.1754944e-38, %v357_v62  ;;  %v375_v20 = vmul.f32 %v374_v0, %v1435_v52 }
  0xbf   : > { %v1180_v8 = vpop.eup %1179  ;;  %v458_v21 = vmul.f32 %v457_v7, %v1508_v39  ;;  %v485_v23 = vmul.f32 2.1237322e-06, %v1534_v60  ;;  %v496_v28 = vmul.f32 3.8918573e-05, %v1534_v60  ;;  %vm391_vm3 = vweird.f32 %v1521_v53 }
  0xc0   : > { %v347_v15 = vmul.f32 %v1180_v8, %v345_v40  ;;  %v1182_v24 = vpop.eup %1181  ;;  %v1554_v26 = vadd.f32 1.0, %v424_v17  ;;  %v448_v27 = vadd.f32 0.0036580483, %v447_v18  ;;  %vm352_vm4 = vweird.f32 %v1180_v8 }
  0xc1   : > { %v387_v30 = vmul.f32 %v1182_v24, %v1521_v53  ;;  %v459_v34 = vadd.f32 0.014752088, %v458_v21  ;;  %v486_v36 = vadd.f32 0.00028619796, %v485_v23  ;;  %v395_v52 = vand.u32 2147483647, %v1521_v53  ;;  %vm353_vm5 = vmor %vm351_vm1, %vm352_vm4 }
  0xc2   : > { %v348_v51 = vsub.f32 1.0, %v347_v15  ;;  %1183 = vrcp.f32 %v1554_v26  ;;  %v397_v41 = vand.u32 2147483648, %v1521_v53  ;;  %v449_v43 = vmul.f32 %v448_v27, %v1508_v39 }
  0xc3   : > { %v388_v38 = vsub.f32 1.0, %v387_v30  ;;  %v460_v46 = vmul.f32 %v459_v34, %v1508_v39  ;;  %v413_v63 = vmul.f32 %v412_v13, %v1458_v32  ;;  %v487_v47 = vmul.f32 %v486_v36, %v1534_v60 }
  0xc4   : > { %v349_v37 = vmul.f32 %v1180_v8, %v348_v51  ;;  %v497_v48 = vadd.f32 0.001143296, %v496_v28  ;;  %vm392_vm6 = vweird.f32 %v1182_v24  ;;  %v450_v54 = vadd.f32 0.05243302, %v449_v43 }
  0xc5   : > { %v389_v50 = vmul.f32 %v1182_v24, %v388_v38  ;;  %v461_v55 = vadd.f32 0.112945676, %v460_v46  ;;  %vm1567_vm7 = vcmp.eq.f32.partialorder %v395_v52, 8.507059e+37  ;;  %v488_v10 = vadd.f32 0.0036580483, %v487_v47  ;;  %vm393_vm8 = vmor %vm391_vm3, %vm392_vm6 }
  0xc6   : > { %v350_v31 = vadd.f32 %v1180_v8, %v349_v37  ;;  %v498_v62 = vmul.f32 %v497_v48, %v1534_v60  ;;  %v398_v4 = vor.u32 1.1754944e-38, %v397_v41  ;;  %v451_v13 = vmul.f32 %v450_v54, %v1508_v39 }
  0xc7   : > { %v390_v0 = vadd.f32 %v1182_v24, %v389_v50  ;;  %v462_v40 = vmul.f32 %v461_v55, %v1508_v39  ;;  %v435_v21 = vand.u32 2147483647, %v1554_v26  ;;  %v489_v16 = vmul.f32 %v488_v10, %v1534_v60 }
  0xc8   : > { %v354_v56 = vsel %vm353_vm5, %v1180_v8, %v350_v31  ;;  %v1184_v5 = vpop.eup %1183  ;;  %v414_v8 = vadd.f32 1.1283791, %v413_v63  ;;  %v499_v15 = vadd.f32 0.014752088, %v498_v62  ;;  %v437_v28 = vand.u32 2147483648, %v1554_v26 }
  0xc9   : > { %v359_v32 = vsel %vm1545_vm2, %v358_v19, %v354_v56  ;;  %v394_v17 = vsel %vm393_vm8, %v1182_v24, %v390_v0  ;;  %v427_v18 = vmul.f32 %v1184_v5, %v1554_v26  ;;  %v463_v51 = vadd.f32 0.4994258, %v462_v40 }
  0xca   : > { %v360_v7 = vmul.f32 %v359_v32, %v335_v12  ;;  %v399_v23 = vsel %vm1567_vm7, %v398_v4, %v394_v17  ;;  %v525_v12 = vmul.f32 2.1237322e-06, %v1536_v61  ;;  %v500_v30 = vmul.f32 %v499_v15, %v1534_v60 }
  0xcb   : > { %v400_v53 = vmul.f32 %v399_v23, %v375_v20  ;;  %v428_v27 = vsub.f32 1.0, %v427_v18  ;;  %vm432_vm9 = vweird.f32 %v1184_v5  ;;  %v452_v34 = vadd.f32 0.18741608, %v451_v13 }
  0xcc   : > { %v1109_v19 = vclamps-f32 %v360_v7, 1.0  ;;  %v464_v36 = vmul.f32 %v463_v51, %v1508_v39  ;;  %v490_v38 = vadd.f32 0.05243302, %v489_v16  ;;  %v501_v41 = vadd.f32 0.112945676, %v500_v30 }
  0xcd   : > { %v1110_v37 = vclamps-f32 %v400_v53, 1.0  ;;  %v429_v52 = vmul.f32 %v1184_v5, %v428_v27  ;;  %v415_v46 = vmul.f32 %v414_v8, %v1451_v14  ;;  %v526_v20 = vadd.f32 0.00028619796, %v525_v12 }
  0xce   : > { %v643_v24 = vadd.f32 1.0, %v1109_v19  ;;  %v1589_v31 = vadd.f32 1.0, %v464_v36  ;;  %vm431_vm10 = vweird.f32 %v1554_v26  ;;  %v502_v48 = vmul.f32 %v501_v41, %v1534_v60 }
  0xcf   : > { %v644_v63 = vadd.f32 1.0, %v1110_v37  ;;  %v430_v47 = vadd.f32 %v1184_v5, %v429_v52  ;;  %vm433_vm11 = vmor %vm431_vm10, %vm432_vm9  ;;  %vm436_vm12 = vcmp.eq.f32.partialorder %v435_v21, 8.507059e+37  ;;  %v438_v50 = vor.u32 1.1754944e-38, %v437_v28 }
  0xd0   : > { %v651_v43 = vmul.f32 %v643_v24, %v1528_v58  ;;  %v453_v54 = vmul.f32 %v452_v34, %v1508_v39  ;;  %1185 = vrcp.f32 %v1589_v31  ;;  %v491_v55 = vmul.f32 %v490_v38, %v1534_v60 }
  0xd1   : > { %v652_v14 = vmul.f32 %v644_v63, %v1531_v59  ;;  %v434_v58 = vsel %vm433_vm11, %v1184_v5, %v430_v47  ;;  %v503_v56 = vadd.f32 0.4994258, %v502_v48  ;;  %v527_v26 = vmul.f32 %v526_v20, %v1536_v61 }
  0xd2   : > { %753 = vmatmul.f32.vlgmr.msra.gmra.mxu2 %v651_v43  ;;  %811 = vmatmul.f32.vlgmr.msrb.gmra.mxu0 %v651_v43  ;;  %v439_v57 = vsel %vm436_vm12, %v438_v50, %v434_v58  ;;  %v536_v32 = vmul.f32 3.8918573e-05, %v1536_v61  ;;  %v1602_v39 = vmin.f32 %v1540_v3, 16.0  ;;  %v454_v0 = vadd.f32 1.1283791, %v453_v54 }
  0xd3   : > { %782 = vmatmul.f32.vlgmr.msra.gmra.mxu3 %v652_v14  ;;  %840 = vmatmul.f32.vlgmr.msrb.gmra.mxu1 %v652_v14  ;;  %v440_v10 = vmul.f32 %v439_v57, %v415_v46  ;;  %v504_v62 = vmul.f32 %v503_v56, %v1534_v60  ;;  %v565_v59 = vmul.f32 2.1237322e-06, %v1542_v9  ;;  %v492_v40 = vadd.f32 0.18741608, %v491_v55 }
  0xd4   : > { %v537_v7 = vadd.f32 0.001143296, %v536_v32  ;;  %v528_v13 = vadd.f32 0.0036580483, %v527_v26  ;;  %v576_v17 = vmul.f32 3.8918573e-05, %v1542_v9  ;;  %v455_v30 = vmul.f32 %v454_v0, %v1471_v1 }
  0xd5   : > { %v1111_v4 = vclamps-f32 %v440_v10, 1.0  ;;  %v1605_v5 = vadd.f32 1.0, %v504_v62  ;;  %v566_v15 = vadd.f32 0.00028619796, %v565_v59  ;;  %v309_v18 = vmul.f32 0.5, %v1444_v6 }
  0xd6   : > { %v1186_v8 = vpop.eup %1185  ;;  %v1612_v3 = vmul.f32 0.5, %v1462_v42  ;;  %v475_v19 = vand.u32 2147483647, %v1589_v31  ;;  %v477_v23 = vand.u32 2147483648, %v1589_v31  ;;  %v605_v51 = vmul.f32 2.1237322e-06, %v1602_v39 }
  0xd7   : > { %v645_v21 = vadd.f32 1.0, %v1111_v4  ;;  %v467_v16 = vmul.f32 %v1186_v8, %v1589_v31  ;;  %1187 = vrcp.f32 %v1605_v5  ;;  %v538_v27 = vmul.f32 %v537_v7, %v1536_v61 }
  0xd8   : > { %v567_v28 = vmul.f32 %v566_v15, %v1542_v9  ;;  %v493_v24 = vmul.f32 %v492_v40, %v1534_v60  ;;  %v529_v34 = vmul.f32 %v528_v13, %v1536_v61  ;;  %v577_v36 = vadd.f32 0.001143296, %v576_v17 }
  0xd9   : > { %v653_v12 = vmul.f32 %v645_v21, %v309_v18  ;;  %v468_v53 = vsub.f32 1.0, %v467_v16  ;;  %vm471_vm13 = vweird.f32 %v1589_v31  ;;  %vm472_vm14 = vweird.f32 %v1186_v8 }
  0xda   : > { %v539_v52 = vadd.f32 0.014752088, %v538_v27  ;;  %vm1623_vm15 = vcmp.eq.f32.partialorder %v475_v19, 8.507059e+37  ;;  %v478_v41 = vor.u32 1.1754944e-38, %v477_v23  ;;  %v578_v43 = vmul.f32 %v577_v36, %v1542_v9  ;;  %vm473_vm0 = vmor %vm471_vm13, %vm472_vm14 }
  0xdb   : > { %756 = vmatmul.f32.gmra.mxu2 %v653_v12  ;;  %v469_v37 = vmul.f32 %v1186_v8, %v468_v53  ;;  %814 = vmatmul.f32.gmra.mxu0 %v653_v12  ;;  %v616_v1 = vmul.f32 3.8918573e-05, %v1602_v39  ;;  %v568_v63 = vadd.f32 0.0036580483, %v567_v28  ;;  %v606_v47 = vadd.f32 0.00028619796, %v605_v51 }
  0xdc   : > { %v540_v20 = vmul.f32 %v539_v52, %v1536_v61  ;;  %v494_v31 = vadd.f32 1.1283791, %v493_v24  ;;  %v530_v50 = vadd.f32 0.05243302, %v529_v34  ;;  %v579_v54 = vadd.f32 0.014752088, %v578_v43 }
  0xdd   : > { %v1188_v60 = vpop.eup %1187  ;;  %v470_v46 = vadd.f32 %v1186_v8, %v469_v37  ;;  %v515_v58 = vand.u32 2147483647, %v1605_v5  ;;  %v517_v55 = vand.u32 2147483648, %v1605_v5  ;;  %v617_v62 = vadd.f32 0.001143296, %v616_v1 }
  0xde   : > { %v507_v48 = vmul.f32 %v1188_v60, %v1605_v5  ;;  %v541_v56 = vadd.f32 0.112945676, %v540_v20  ;;  %v580_v10 = vmul.f32 %v579_v54, %v1542_v9  ;;  %v569_v59 = vmul.f32 %v568_v63, %v1542_v9 }
  0xdf   : > { %v474_v14 = vsel %vm473_vm0, %v1186_v8, %v470_v46  ;;  %v607_v4 = vmul.f32 %v606_v47, %v1602_v39  ;;  %vm512_vm1 = vweird.f32 %v1188_v60  ;;  %v618_v8 = vmul.f32 %v617_v62, %v1602_v39 }
  0xe0   : > { %v479_v57 = vsel %vm1623_vm15, %v478_v41, %v474_v14  ;;  %v508_v26 = vsub.f32 1.0, %v507_v48  ;;  %v542_v0 = vmul.f32 %v541_v56, %v1536_v61  ;;  %v581_v7 = vadd.f32 0.112945676, %v580_v10 }
  0xe1   : > { %v480_v32 = vmul.f32 %v479_v57, %v455_v30  ;;  %v495_v15 = vmul.f32 %v494_v31, %v1492_v25  ;;  %vm511_vm2 = vweird.f32 %v1605_v5  ;;  %vm516_vm3 = vcmp.eq.f32.partialorder %v515_v58, 8.507059e+37 }
  0xe2   : > { %v509_v40 = vmul.f32 %v1188_v60, %v508_v26  ;;  %v543_v17 = vadd.f32 0.4994258, %v542_v0  ;;  %v582_v21 = vmul.f32 %v581_v7, %v1542_v9  ;;  %v619_v16 = vadd.f32 0.014752088, %v618_v8  ;;  %vm513_vm4 = vmor %vm511_vm2, %vm512_vm1 }
  0xe3   : > { %v1112_v13 = vclamps-f32 %v480_v32, 1.0  ;;  %v518_v23 = vor.u32 1.1754944e-38, %v517_v55  ;;  %v608_v12 = vadd.f32 0.0036580483, %v607_v4  ;;  %v570_v27 = vadd.f32 0.05243302, %v569_v59 }
  0xe4   : > { %v510_v18 = vadd.f32 %v1188_v60, %v509_v40  ;;  %v544_v51 = vmul.f32 %v543_v17, %v1536_v61  ;;  %v583_v28 = vadd.f32 0.4994258, %v582_v21  ;;  %v620_v30 = vmul.f32 %v619_v16, %v1602_v39 }
  0xe5   : > { %v646_v19 = vadd.f32 1.0, %v1112_v13  ;;  %v531_v36 = vmul.f32 %v530_v50, %v1536_v61  ;;  %v609_v38 = vmul.f32 %v608_v12, %v1602_v39  ;;  %v571_v43 = vmul.f32 %v570_v27, %v1542_v9 }
  0xe6   : > { %v514_v53 = vsel %vm513_vm4, %v1188_v60, %v510_v18  ;;  %v545_v24 = vadd.f32 1.0, %v544_v51  ;;  %v584_v37 = vmul.f32 %v583_v28, %v1542_v9  ;;  %v621_v52 = vadd.f32 0.112945676, %v620_v30 }
  0xe7   : > { %v654_v25 = vmul.f32 %v646_v19, %v1612_v3  ;;  %v519_v5 = vsel %vm516_vm3, %v518_v23, %v514_v53  ;;  %v311_v3 = vmul.f32 0.5, %v1474_v2  ;;  %v532_v20 = vadd.f32 0.18741608, %v531_v36 }
  0xe8   : > { %v520_v34 = vmul.f32 %v519_v5, %v495_v15  ;;  %1189 = vrcp.f32 %v545_v24  ;;  %v585_v1 = vadd.f32 1.0, %v584_v37  ;;  %v622_v60 = vmul.f32 %v621_v52, %v1602_v39 }
  0xe9   : > { %785 = vmatmul.f32.gmra.mxu3 %v654_v25  ;;  %843 = vmatmul.f32.gmra.mxu1 %v654_v25  ;;  %v610_v63 = vadd.f32 0.05243302, %v609_v38  ;;  %v572_v48 = vadd.f32 0.18741608, %v571_v43  ;;  %v533_v14 = vmul.f32 %v532_v20, %v1536_v61  ;;  %v557_v62 = vand.u32 2147483648, %v545_v24 }
  0xea   : > { %v1113_v41 = vclamps-f32 %v520_v34, 1.0  ;;  %1191 = vrcp.f32 %v585_v1  ;;  %v623_v47 = vadd.f32 0.4994258, %v622_v60  ;;  %v555_v4 = vand.u32 2147483647, %v545_v24 }
  0xeb   : > { %v611_v55 = vmul.f32 %v610_v63, %v1602_v39  ;;  %v573_v10 = vmul.f32 %v572_v48, %v1542_v9  ;;  %v534_v0 = vadd.f32 1.1283791, %v533_v14  ;;  %vm551_vm6 = vweird.f32 %v545_v24 }
  0xec   : > { %v647_v46 = vadd.f32 1.0, %v1113_v41  ;;  %v624_v54 = vmul.f32 %v623_v47, %v1602_v39  ;;  %v597_v13 = vand.u32 2147483648, %v585_v1  ;;  %v558_v15 = vor.u32 1.1754944e-38, %v557_v62 }
  0xed   : > { %v612_v7 = vadd.f32 0.18741608, %v611_v55  ;;  %v574_v61 = vadd.f32 1.1283791, %v573_v10  ;;  %v595_v18 = vand.u32 2147483647, %v585_v1  ;;  %v535_v9 = vmul.f32 %v534_v0, %v1497_v29 }
  0xee   : > { %v655_v31 = vmul.f32 %v647_v46, %v311_v3  ;;  %v1190_v50 = vpop.eup %1189  ;;  %v625_v56 = vadd.f32 1.0, %v624_v54  ;;  %vm556_vm9 = vcmp.eq.f32.partialorder %v555_v4, 8.507059e+37  ;;  %vm591_vm10 = vweird.f32 %v585_v1 }
  0xef   : > { %v547_v58 = vmul.f32 %v1190_v50, %v545_v24  ;;  %vm552_vm5 = vweird.f32 %v1190_v50  ;;  %v613_v51 = vmul.f32 %v612_v7, %v1602_v39  ;;  %v598_v53 = vor.u32 1.1754944e-38, %v597_v13 }
  0xf0   : > { %759 = vmatmul.f32.gmra.mxu2 %v655_v31  ;;  %817 = vmatmul.f32.gmra.mxu0 %v655_v31  ;;  %v1192_v57 = vpop.eup %1191  ;;  %1193 = vrcp.f32 %v625_v56  ;;  %vm553_vm7 = vmor %vm551_vm6, %vm552_vm5  ;;  %v575_v28 = vmul.f32 %v574_v61, %v1505_v35  ;;  %vm596_vm12 = vcmp.eq.f32.partialorder %v595_v18, 8.507059e+37  ;;  %v312_v29 = vmul.f32 0.5, %v1481_v11 }
  0xf1   : > { %v548_v26 = vsub.f32 1.0, %v547_v58  ;;  %v587_v32 = vmul.f32 %v1192_v57, %v585_v1  ;;  %vm592_vm8 = vweird.f32 %v1192_v57  ;;  %v614_v36 = vadd.f32 1.1283791, %v613_v51  ;;  %v1666_v58 = vld [vmem:[%s1804_s3] sm:$0xff] }
  0xf2   : > { %vm593_vm11 = vmor %vm591_vm10, %vm592_vm8  ;;  %v637_v37 = vand.u32 2147483648, %v625_v56  ;;  %v635_v39 = vand.u32 2147483647, %v625_v56  ;;  %vm631_vm14 = vweird.f32 %v625_v56  ;;  %v313_v35 = vmul.f32 0.5, %v1488_v22 }
  0xf3   : > { %v549_v59 = vmul.f32 %v1190_v50, %v548_v26  ;;  %v588_v40 = vsub.f32 1.0, %v587_v32  ;;  %v615_v46 = vmul.f32 %v614_v36, %v1519_v49  ;;  %v724_v49 = vperm.slane %v1666_v58, 5 }
  0xf4   : > { %v638_v3 = vor.u32 1.1754944e-38, %v637_v37  ;;  %vm636_vm0 = vcmp.eq.f32.partialorder %v635_v39, 8.507059e+37  ;;  %v723_v55 = vperm.slane %v1666_v58, 1 }
  0xf5   : > { %v550_v8 = vadd.f32 %v1190_v50, %v549_v59  ;;  %v589_v17 = vmul.f32 %v1192_v57, %v588_v40 }
  0xf6   : > { %v1194_v16 = vpop.eup %1193  ;;  %v727_v26 = vperm.slane %v723_v55, 1 }
  0xf7   : > { %v554_v21 = vsel %vm553_vm7, %v1190_v50, %v550_v8  ;;  %v590_v23 = vadd.f32 %v1192_v57, %v589_v17  ;;  %v627_v27 = vmul.f32 %v1194_v16, %v625_v56  ;;  %vm632_vm13 = vweird.f32 %v1194_v16 }
  0xf8   : > { %v559_v19 = vsel %vm556_vm9, %v558_v15, %v554_v21  ;;  %vm633_vm15 = vmor %vm631_vm14, %vm632_vm13  ;;  %v314_v50 = vmul.f32 0.5, %v1500_v33  ;;  %v728_v56 = vperm.slane %v724_v49, 1  ;;  %v729_v32 = vadd.f32 %v727_v26, %v1426_v44 }
  0xf9   : > { %v560_v12 = vmul.f32 %v559_v19, %v535_v9  ;;  %v594_v30 = vsel %vm593_vm11, %v1192_v57, %v590_v23  ;;  %v628_v24 = vsub.f32 1.0, %v627_v27  ;;  %v731_v21 = vadd.f32 %v727_v26, %v1444_v6 }
  0xfa   : > { %v599_v5 = vsel %vm596_vm12, %v598_v53, %v594_v30  ;;  %v730_v10 = vadd.f32 %v728_v56, %v1429_v45  ;;  %v732_v17 = vadd.f32 %v728_v56, %v1462_v42  ;;  %v734_v30 = vadd.f32 %v728_v56, %v1481_v11 }
  0xfb   : > { %v1114_v25 = vclamps-f32 %v560_v12, 1.0  ;;  %v600_v34 = vmul.f32 %v599_v5, %v575_v28  ;;  %v629_v38 = vmul.f32 %v1194_v16, %v628_v24  ;;  %v733_v24 = vadd.f32 %v727_v26, %v1474_v2 }
  0xfc   : > { %v736_v2 = vadd.f32 %v728_v56, %v1500_v33 }
  0xfd   : > { %v648_v52 = vadd.f32 1.0, %v1114_v25  ;;  %v1115_v41 = vclamps-f32 %v600_v34, 1.0  ;;  %v630_v1 = vadd.f32 %v1194_v16, %v629_v38 }
  0xff   : > { %v656_v43 = vmul.f32 %v648_v52, %v312_v29  ;;  %v649_v60 = vadd.f32 1.0, %v1115_v41  ;;  %v634_v20 = vsel %vm633_vm15, %v1194_v16, %v630_v1  ;;  %v735_v1 = vadd.f32 %v727_v26, %v1488_v22 }
 0x100   : > { %v639_v47 = vsel %vm636_vm0, %v638_v3, %v634_v20 }
 0x101   : > { %788 = vmatmul.f32.gmra.mxu3 %v656_v43  ;;  %846 = vmatmul.f32.gmra.mxu1 %v656_v43  ;;  %v657_v63 = vmul.f32 %v649_v60, %v313_v35  ;;  %v640_v31 = vmul.f32 %v639_v47, %v615_v46 }
 0x103   : > { %762 = vmatmul.f32.gmra.mxu2 %v657_v63  ;;  %820 = vmatmul.f32.gmra.mxu0 %v657_v63  ;;  %v1116_v48 = vclamps-f32 %v640_v31, 1.0 }
 0x105   : > { %v650_v54 = vadd.f32 1.0, %v1116_v48 }
 0x107   : > { %v658_v14 = vmul.f32 %v650_v54, %v314_v50 }
 0x109   : > { %791 = vmatmul.f32.gmra.mxu3 %v658_v14  ;;  %849 = vmatmul.f32.gmra.mxu1 %v658_v14 }
 0x14f   : > { %v812_v57 = vpop.f32.mrf.mxu0 }
 0x150   : > { %v813_v62 = vadd.f32 %v812_v57, %v730_v10  ;;  %v841_v59 = vpop.f32.mrf.mxu1 }
 0x152   : > { %v1672_v40 = vadd.f32 %v841_v59, %v813_v62 }
 0x154   : > { %v870_v45 = vmul.f32 %v1672_v40, %v1672_v40 }
 0x155   : > { %v754_v0 = vpop.f32.mrf.mxu2 }
 0x156   : > { %v755_v4 = vadd.f32 %v754_v0, %v729_v32  ;;  %v783_v7 = vpop.f32.mrf.mxu3  ;;  %v965_v0 = vperm.slane %v1666_v58, 2 }
 0x158   : > { %v1674_v8 = vadd.f32 %v783_v7, %v755_v4  ;;  %v815_v44 = vpop.f32.mrf.mxu0  ;;  %v966_v7 = vperm.slane %v1666_v58, 6 }
 0x159   : > { %v816_v9 = vadd.f32 %v815_v44, %v732_v17  ;;  %v980_v44 = vperm.slane %v1666_v58, 7 }
 0x15a   : > { %v853_v61 = vadd.f32 %v1672_v40, %v1674_v8  ;;  %v869_v13 = vmul.f32 %v1674_v8, %v1674_v8 }
 0x15c   : > { %854 = vadd.xlane.f32.xlu0 %v853_v61  ;;  %v877_v15 = vadd.f32 %v870_v45, %v869_v13  ;;  %v979_v13 = vperm.slane %v1666_v58, 3  ;;  %v1733_v58 = vperm.slane %v980_v44, 3 }
 0x15e   : > { %878 = vadd.xlane.f32.xlu2 %v877_v15  ;;  %v757_v18 = vpop.f32.mrf.mxu2 }
 0x15f   : > { %v758_v16 = vadd.f32 %v757_v18, %v731_v21 }
 0x166   : > { %v844_v19 = vpop.f32.mrf.mxu1 }
 0x167   : > { %v1684_v23 = vadd.f32 %v844_v19, %v816_v9  ;;  %v1723_v9 = vperm.slane %v965_v0, 2 }
 0x169   : > { %v872_v42 = vmul.f32 %v1684_v23, %v1684_v23 }
 0x16c   : > { %v786_v51 = vpop.f32.mrf.mxu3 }
 0x16d   : > { %v1686_v12 = vadd.f32 %v786_v51, %v758_v16  ;;  %v818_v6 = vpop.f32.mrf.mxu0  ;;  %v1727_v51 = vperm.slane %v966_v7, 2 }
 0x16e   : > { %v819_v5 = vadd.f32 %v818_v6, %v734_v30 }
 0x16f   : > { %v856_v53 = vadd.f32 %v1684_v23, %v1686_v12  ;;  %v871_v27 = vmul.f32 %v1686_v12, %v1686_v12 }
 0x171   : > { %857 = vadd.xlane.f32.xlu0 %v856_v53  ;;  %v880_v28 = vadd.f32 %v872_v42, %v871_v27  ;;  %v1729_v27 = vperm.slane %v979_v13, 3 }
 0x173   : > { %881 = vadd.xlane.f32.xlu2 %v880_v28  ;;  %v760_v25 = vpop.f32.mrf.mxu2 }
 0x174   : > { %v761_v29 = vadd.f32 %v760_v25, %v733_v24 }
 0x17e   : > { %v847_v34 = vpop.f32.mrf.mxu1 }
 0x17f   : > { %v1696_v36 = vadd.f32 %v847_v34, %v819_v5 }
 0x180   : > { %v821_v41 = vpop.f32.mrf.mxu0 }
 0x181   : > { %v874_v11 = vmul.f32 %v1696_v36, %v1696_v36  ;;  %v822_v60 = vadd.f32 %v821_v41, %v736_v2 }
 0x184   : > { %v789_v37 = vpop.f32.mrf.mxu3 }
 0x185   : > { %v1698_v52 = vadd.f32 %v789_v37, %v761_v29 }
 0x186   : > { %v763_v43 = vpop.f32.mrf.mxu2  ;;  %v850_v46 = vpop.f32.mrf.mxu1 }
 0x187   : > { %v859_v38 = vadd.f32 %v1696_v36, %v1698_v52  ;;  %v873_v39 = vmul.f32 %v1698_v52, %v1698_v52  ;;  %v764_v3 = vadd.f32 %v763_v43, %v735_v1  ;;  %v1708_v63 = vadd.f32 %v850_v46, %v822_v60 }
 0x189   : > { %860 = vadd.xlane.f32.xlu1 %v859_v38  ;;  %v883_v35 = vadd.f32 %v874_v11, %v873_v39  ;;  %v876_v22 = vmul.f32 %v1708_v63, %v1708_v63 }
 0x18b   : > { %884 = vadd.xlane.f32.xlu0 %v883_v35 }
 0x18c   : > { %v792_v20 = vpop.f32.mrf.mxu3 }
 0x18d   : > { %v1710_v47 = vadd.f32 %v792_v20, %v764_v3 }
 0x18f   : > { %v862_v31 = vadd.f32 %v1708_v63, %v1710_v47  ;;  %v875_v33 = vmul.f32 %v1710_v47, %v1710_v47 }
 0x191   : > { %863 = vadd.xlane.f32.xlu1 %v862_v31  ;;  %v886_v48 = vadd.f32 %v876_v22, %v875_v33 }
 0x199   : > { %887 = vadd.xlane.f32.xlu1 %v886_v48 }
 0x1cf   : > { %v855_v50 = vpop.xlane.xlu0 %854 }
 0x1d0   : > { %v865_v54 = vmul.f32 0.00390625, %v855_v50 }
 0x1d1   : > { %v879_v14 = vpop.xlane.xlu2 %878 }
 0x1d2   : > { %v889_v49 = vmul.f32 0.00390625, %v879_v14  ;;  %v893_v55 = vmul.f32 %v865_v54, %v865_v54  ;;  %v905_v16 = vsub.f32 %v1674_v8, %v865_v54  ;;  %v906_v19 = vsub.f32 %v1672_v40, %v865_v54 }
 0x1d4   : > { %v897_v56 = vsub.f32 %v889_v49, %v893_v55 }
 0x1d6   : > { %v901_v57 = vmax.f32 %v897_v56, 0.0 }
 0x1d8   : > { %v913_v26 = vadd.f32 1e-05, %v901_v57 }
 0x1da   : > { %1195 = vrsqrt.f32 %v913_v26  ;;  %vm923_vm2 = vweird.f32 %v913_v26 }
 0x1e0   : > { %v1196_v10 = vpop.eup %1195 }
 0x1e1   : > { %v918_v62 = vmul.f32 %v1196_v10, %v913_v26  ;;  %vm924_vm1 = vweird.f32 %v1196_v10 }
 0x1e2   : > { %vm925_vm3 = vmor %vm923_vm2, %vm924_vm1 }
 0x1e3   : > { %v919_v32 = vmul.f32 %v1196_v10, %v918_v62 }
 0x1e4   : > { %v858_v4 = vpop.xlane.xlu0 %857 }
 0x1e5   : > { %v920_v59 = vmul.f32 0.5, %v919_v32  ;;  %v866_v61 = vmul.f32 0.00390625, %v858_v4 }
 0x1e6   : > { %v882_v15 = vpop.xlane.xlu2 %881 }
 0x1e7   : > { %v921_v45 = vsub.f32 1.5, %v920_v59  ;;  %v890_v17 = vmul.f32 0.00390625, %v882_v15  ;;  %v894_v18 = vmul.f32 %v866_v61, %v866_v61  ;;  %v907_v2 = vsub.f32 %v1686_v12, %v866_v61 }
 0x1e8   : > { %v908_v1 = vsub.f32 %v1684_v23, %v866_v61 }
 0x1e9   : > { %v922_v21 = vmul.f32 %v1196_v10, %v921_v45  ;;  %v898_v53 = vsub.f32 %v890_v17, %v894_v18 }
 0x1eb   : > { %v926_v42 = vsel %vm925_vm3, %v1196_v10, %v922_v21  ;;  %v902_v30 = vmax.f32 %v898_v53, 0.0 }
 0x1ec   : > { %v957_v28 = vmul.f32 %v926_v42, %v905_v16  ;;  %v958_v6 = vmul.f32 %v926_v42, %v906_v19 }
 0x1ed   : > { %v914_v5 = vadd.f32 1e-05, %v902_v30 }
 0x1ee   : > { %v971_v25 = vmul.f32 %v1723_v9, %v957_v28  ;;  %v972_v8 = vmul.f32 %v1727_v51, %v958_v6 }
 0x1ef   : > { %1197 = vrsqrt.f32 %v914_v5  ;;  %vm933_vm5 = vweird.f32 %v914_v5 }
 0x1f0   : > { %v985_v40 = vadd.f32 %v1729_v27, %v971_v25  ;;  %v986_v24 = vadd.f32 %v1733_v58, %v972_v8 }
 0x1f2   : > { %993 = vst [vmem:[%s1739_s27] sm:$0xff] %v985_v40 }
 0x1f3   : > { %994 = vst [vmem:[%s1739_s27 + $0x8] sm:$0xff] %v986_v24 }
 0x1f5   : > { %v1198_v29 = vpop.eup %1197 }
 0x1f6   : > { %v928_v34 = vmul.f32 %v1198_v29, %v914_v5  ;;  %vm934_vm4 = vweird.f32 %v1198_v29 }
 0x1f7   : > { %vm935_vm6 = vmor %vm933_vm5, %vm934_vm4 }
 0x1f8   : > { %v929_v37 = vmul.f32 %v1198_v29, %v928_v34 }
 0x1fa   : > { %v930_v38 = vmul.f32 0.5, %v929_v37 }
 0x1fc   : > { %v931_v39 = vsub.f32 1.5, %v930_v38  ;;  %v861_v11 = vpop.xlane.xlu1 %860 }
 0x1fd   : > { %v867_v43 = vmul.f32 0.00390625, %v861_v11 }
 0x1fe   : > { %v932_v41 = vmul.f32 %v1198_v29, %v931_v39  ;;  %v885_v35 = vpop.xlane.xlu0 %884 }
 0x1ff   : > { %v895_v3 = vmul.f32 %v867_v43, %v867_v43  ;;  %v891_v31 = vmul.f32 0.00390625, %v885_v35  ;;  %v909_v13 = vsub.f32 %v1698_v52, %v867_v43  ;;  %v910_v45 = vsub.f32 %v1696_v36, %v867_v43 }
 0x200   : > { %v936_v60 = vsel %vm935_vm6, %v1198_v29, %v932_v41 }
 0x201   : > { %v959_v46 = vmul.f32 %v936_v60, %v907_v2  ;;  %v960_v20 = vmul.f32 %v936_v60, %v908_v1  ;;  %v899_v48 = vsub.f32 %v891_v31, %v895_v3 }
 0x203   : > { %v973_v33 = vmul.f32 %v1723_v9, %v959_v46  ;;  %v974_v22 = vmul.f32 %v1727_v51, %v960_v20  ;;  %v903_v12 = vmax.f32 %v899_v48, 0.0 }
 0x204   : > { %v864_v14 = vpop.xlane.xlu1 %863 }
 0x205   : > { %v987_v50 = vadd.f32 %v1729_v27, %v973_v33  ;;  %v988_v54 = vadd.f32 %v1733_v58, %v974_v22  ;;  %v915_v23 = vadd.f32 1e-05, %v903_v12  ;;  %v868_v49 = vmul.f32 0.00390625, %v864_v14 }
 0x207   : > { %995 = vst [vmem:[%s1739_s27 + $0x10] sm:$0xff] %v987_v50  ;;  %1199 = vrsqrt.f32 %v915_v23  ;;  %v896_v26 = vmul.f32 %v868_v49, %v868_v49  ;;  %vm943_vm8 = vweird.f32 %v915_v23  ;;  %v911_v30 = vsub.f32 %v1710_v47, %v868_v49 }
 0x208   : > { %996 = vst [vmem:[%s1739_s27 + $0x18] sm:$0xff] %v988_v54  ;;  %v912_v25 = vsub.f32 %v1708_v63, %v868_v49 }
 0x20c   : > { %v888_v56 = vpop.xlane.xlu1 %887 }
 0x20d   : > { %v1200_v55 = vpop.eup %1199  ;;  %v892_v10 = vmul.f32 0.00390625, %v888_v56 }
 0x20e   : > { %v938_v57 = vmul.f32 %v1200_v55, %v915_v23  ;;  %vm944_vm7 = vweird.f32 %v1200_v55 }
 0x20f   : > { %v900_v32 = vsub.f32 %v892_v10, %v896_v26  ;;  %vm945_vm9 = vmor %vm943_vm8, %vm944_vm7 }
 0x210   : > { %v939_v62 = vmul.f32 %v1200_v55, %v938_v57 }
 0x211   : > { %v904_v59 = vmax.f32 %v900_v32, 0.0 }
 0x212   : > { %v940_v0 = vmul.f32 0.5, %v939_v62 }
 0x213   : > { %v916_v7 = vadd.f32 1e-05, %v904_v59 }
 0x214   : > { %v941_v4 = vsub.f32 1.5, %v940_v0 }
 0x215   : > { %1201 = vrsqrt.f32 %v916_v7  ;;  %vm953_vm11 = vweird.f32 %v916_v7 }
 0x216   : > { %v942_v61 = vmul.f32 %v1200_v55, %v941_v4 }
 0x218   : > { %v946_v15 = vsel %vm945_vm9, %v1200_v55, %v942_v61 }
 0x219   : > { %v961_v44 = vmul.f32 %v946_v15, %v909_v13  ;;  %v962_v17 = vmul.f32 %v946_v15, %v910_v45 }
 0x21b   : > { %v975_v18 = vmul.f32 %v1723_v9, %v961_v44  ;;  %v976_v21 = vmul.f32 %v1727_v51, %v962_v17  ;;  %v1202_v16 = vpop.eup %1201 }
 0x21c   : > { %v948_v42 = vmul.f32 %v1202_v16, %v916_v7  ;;  %vm954_vm10 = vweird.f32 %v1202_v16 }
 0x21d   : > { %v989_v19 = vadd.f32 %v1729_v27, %v975_v18  ;;  %v990_v53 = vadd.f32 %v1733_v58, %v976_v21  ;;  %vm955_vm12 = vmor %vm953_vm11, %vm954_vm10 }
 0x21e   : > { %v949_v52 = vmul.f32 %v1202_v16, %v948_v42 }
 0x21f   : > { %997 = vst [vmem:[%s1739_s27 + $0x20] sm:$0xff] %v989_v19 }
 0x220   : > { %998 = vst [vmem:[%s1739_s27 + $0x28] sm:$0xff] %v990_v53  ;;  %v950_v36 = vmul.f32 0.5, %v949_v52 }
 0x222   : > { %v951_v28 = vsub.f32 1.5, %v950_v36 }
 0x224   : > { %v952_v6 = vmul.f32 %v1202_v16, %v951_v28 }
 0x226   : > { %v956_v8 = vsel %vm955_vm12, %v1202_v16, %v952_v6 }
 0x227   : > { %v963_v5 = vmul.f32 %v956_v8, %v911_v30  ;;  %v964_v40 = vmul.f32 %v956_v8, %v912_v25 }
 0x229   : > { %v977_v24 = vmul.f32 %v1723_v9, %v963_v5  ;;  %v978_v29 = vmul.f32 %v1727_v51, %v964_v40 }
 0x22b   : > { %v991_v47 = vadd.f32 %v1729_v27, %v977_v24  ;;  %v992_v63 = vadd.f32 %v1733_v58, %v978_v29 }
 0x22d   : > { %999 = vst [vmem:[%s1739_s27 + $0x30] sm:$0xff] %v991_v47 }
 0x22e   : > { %1000 = vst [vmem:[%s1739_s27 + $0x38] sm:$0xff] %v992_v63 }
 0x22f   : > { %1261 = shalt.err (!%p1258_p8)
}
 0x230   : > { %s1305_s20 = smov 256   ;;  %s1306_s22 = smov 16  }
 0x231   : > { %1129 = dma.vmem_to_hbm [thread:$0]  (%p1370_p5), %s1016_s6, 1024, %s1018_s19, %s1002_s7, %s1305_s20, %s1305_s20, %s1306_s22  }
 0x232 PF: > { %p1141_p9 = scmp.ge.s32.totalorder %s1300_s18, 2  ;;  %s1032_s23 = sand.u32 1, %s1288_s15  }
 0x233   : > { %s1033_s27 = scalar_lea.sflag [#allocation4], %s1032_s23 }
 0x234   : > { %p1136_p10 = pnand %p1141_p9, %p1374_p6 }
 0x236   : > { %p1137_p11 = pneg %p1136_p10 }
 0x238   : > { %1283 = dma.done.wait (%p1137_p11), %s1033_s27, 1024  }
 0x239   : > { %1285 = vsyncadd (%p1137_p11), %s1033_s27, 4294966272  ;;  %p15_p12 = scmp.ge.s32.totalorder %s1357_s21, 4   ;;  %s1814_s15 = smov %s1292_s16 }
 0x23a   : > { %s1815_s16 = smov %s1296_s17  ;;  %s1816_s17 = smov %s1368_s24 }
 0x23b   : > { %s1817_s18 = smov %s1357_s21  ;;  %17 = sbr.rel (!%p15_p12) target bundleno = 4 (0x4), region = 76 }
 0x240   :  { %1039 = vsyncpa [#allocation3], 1 }
 0x241   :  { %1041 = vsyncpa [#allocation3 + $0x1], 1 }
 0x242   :  { %1042 = vsyncpa [#allocation4], 1 }
 0x243   :  { %1044 = vsyncpa [#allocation4 + $0x1], 1 }

</bundles_post_ra>
